<compile_context>
chip_gen: v5e
topology: v5e:2x2
jax: 0.10.0
libtpu: 0.0.40
codegen_flags: <defaults>
</compile_context>

<pallas_src>
import numpy as np
import jax
import jax.numpy as jnp
from jax.experimental import pallas as pl
from jax.experimental.pallas import tpu as pltpu


# ----------------------------------------------------------------------------
# Fused relational-encoding kernel (TB batch elements per grid step)
# ----------------------------------------------------------------------------
def _rel_enc_kernel(x_ref, wa_ref, wb_ref, bias_ref, si_ref, sj_ref, o_ref):
    tb, P, d = o_ref.shape
    S = x_ref.shape[0] // tb

    x = x_ref[...]                                                  # (tb*S, d)

    # Project every position of the whole batch tile at once (instead of once
    # per pair / once per batch element): two big MXU matmuls.
    xa = jnp.dot(x, wa_ref[...], preferred_element_type=jnp.float32)  # (tb*S, d)
    xb = jnp.dot(x, wb_ref[...], preferred_element_type=jnp.float32)  # (tb*S, d)
    xa = xa.reshape(tb, S, d)
    xb = xb.reshape(tb, S, d)

    si = si_ref[...]                                                # (P, S)
    sj = sj_ref[...]                                                # (P, S)
    bias = bias_ref[...]                                            # (1, d)

    # One-hot pair selection as MXU matmuls: rel[p] = xa[i_p] + xb[j_p] + bias.
    # Static unrolled loop over the (small) batch tile; each iteration is two
    # (P, S) x (S, d) matmuls and a lane-dense (P, d) store.
    for t in range(tb):
        rel = (jnp.dot(si, xa[t], preferred_element_type=jnp.float32)
               + jnp.dot(sj, xb[t], preferred_element_type=jnp.float32)
               + bias)                                              # (P, d)
        o_ref[t] = rel.astype(o_ref.dtype)


def _make_pair_selectors(seq_len):
    """One-hot matrices picking x[i] / x[j] for every pair (i<j), PyTorch order."""
    pairs = [(i, j) for i in range(seq_len) for j in range(i + 1, seq_len)]
    n_pairs = len(pairs)
    si = np.zeros((n_pairs, seq_len), np.float32)
    sj = np.zeros((n_pairs, seq_len), np.float32)
    for p, (i, j) in enumerate(pairs):
        si[p, i] = 1.0
        sj[p, j] = 1.0
    return jnp.asarray(si), jnp.asarray(sj)


def relational_encoding(x, w, b, *, batch_tile=None):
    """x: (B, S, d).  w: (2d, d) so that y = concat(xi, xj) @ w + b.  b: (d,)."""
    B, S, d = x.shape
    assert S >= 2, "need at least 2 sequence positions to form pairs"
    assert w.shape == (2 * d, d)
    si, sj = _make_pair_selectors(S)
    P = si.shape[0]

    wa = w[:d]               # acts on x[:, i, :]
    wb = w[d:]               # acts on x[:, j, :]
    b2 = b.reshape(1, d)

    if batch_tile is None:
        # Keep the per-step output tile around ~0.5 MiB and the tile count low.
        bytes_per_batch = P * d * np.dtype(x.dtype).itemsize
        batch_tile = max(1, min(B, 8, (512 * 1024) // max(bytes_per_batch, 1) + 1))
    tb = int(min(batch_tile, B))

    x_flat = x.reshape(B * S, d)          # free reshape in HBM
    grid = (pl.cdiv(B, tb),)

    return pl.pallas_call(
        _rel_enc_kernel,
        out_shape=jax.ShapeDtypeStruct((B, P, d), x.dtype),
        grid=grid,
        in_specs=[
            pl.BlockSpec((tb * S, d), lambda n: (n, 0)),   # x (batch tile, flat)
            pl.BlockSpec((d, d), lambda n: (0, 0)),        # Wa (resident)
            pl.BlockSpec((d, d), lambda n: (0, 0)),        # Wb (resident)
            pl.BlockSpec((1, d), lambda n: (0, 0)),        # bias (resident)
            pl.BlockSpec((P, S), lambda n: (0, 0)),        # Si (resident)
            pl.BlockSpec((P, S), lambda n: (0, 0)),        # Sj (resident)
        ],
        out_specs=pl.BlockSpec((tb, P, d), lambda n: (n, 0, 0)),
        compiler_params=pltpu.CompilerParams(
            dimension_semantics=("parallel",)),            # v7x: shard 2 TCs
    )(x_flat, wa, wb, b2, si, sj)


# ----------------------------------------------------------------------------
# Pure-JAX reference (mirrors the PyTorch loop exactly)
# ----------------------------------------------------------------------------
def relational_encoding_ref(x, w, b):
    B, S, d = x.shape
    outs = []
    for i in range(S):
        for j in range(i + 1, S):
            pair = jnp.concatenate([x[:, i, :], x[:, j, :]], axis=-1)  # (B, 2d)
            outs.append(pair @ w + b)                                  # (B, d)
    return jnp.stack(outs, axis=1)                                     # (B, P, d)


# ----------------------------------------------------------------------------
if __name__ == "__main__":
    B, S, D_MODEL = 2, 8, 128
    P = S * (S - 1) // 2

    root = jax.random.PRNGKey(0)
    kx, kw, kb = jax.random.split(root, 3)

    x = jax.random.normal(kx, (B, S, D_MODEL), jnp.float32)
    # nn.Linear(2d, d): store in "x @ W" layout, i.e. W has shape (2d, d).
    w = 0.1 * jax.random.normal(kw, (2 * D_MODEL, D_MODEL), jnp.float32)
    b = 0.1 * jax.random.normal(kb, (D_MODEL,), jnp.float32)

    out = relational_encoding(x, w, b)
    out = jax.block_until_ready(out)

    assert out.shape == (B, P, D_MODEL), out.shape
    assert bool(jnp.all(jnp.isfinite(out)))

    ref = relational_encoding_ref(x, w, b)
    np.testing.assert_allclose(np.asarray(out), np.asarray(ref),
                               rtol=1e-4, atol=1e-4)

    print("KERNEL_OK")
</pallas_src>

<mosaic_0001>
module attributes {stable_mosaic.version = 11 : i64} {
  func.func @_rel_enc_kernel(%arg0: i32, %arg1: memref<16x128xf32, #tpu.memory_space<vmem>>, %arg2: memref<128x128xf32, #tpu.memory_space<vmem>>, %arg3: memref<128x128xf32, #tpu.memory_space<vmem>>, %arg4: memref<1x128xf32, #tpu.memory_space<vmem>>, %arg5: memref<28x8xf32, #tpu.memory_space<vmem>>, %arg6: memref<28x8xf32, #tpu.memory_space<vmem>>, %arg7: memref<2x28x128xf32, #tpu.memory_space<vmem>>) attributes {dimension_semantics = [#tpu.dimension_semantics<parallel>], iteration_bounds = array<i64: 1>, scalar_prefetch = 0 : i64, scratch_operands = 0 : i64, tpu.core_type = #tpu.core_type<tc>, window_params = [{transform_indices = @transform_0, window_bounds = array<i64: 16, 128>}, {pipeline_mode = #tpu.pipeline_mode<synchronous>, transform_indices = @transform_1, window_bounds = array<i64: 128, 128>}, {pipeline_mode = #tpu.pipeline_mode<synchronous>, transform_indices = @transform_2, window_bounds = array<i64: 128, 128>}, {pipeline_mode = #tpu.pipeline_mode<synchronous>, transform_indices = @transform_3, window_bounds = array<i64: 1, 128>}, {pipeline_mode = #tpu.pipeline_mode<synchronous>, transform_indices = @transform_4, window_bounds = array<i64: 28, 8>}, {pipeline_mode = #tpu.pipeline_mode<synchronous>, transform_indices = @transform_5, window_bounds = array<i64: 28, 8>}, {transform_indices = @transform_6, window_bounds = array<i64: 2, 28, 128>}]} {
    %c0 = arith.constant 0 : index
    %c0_0 = arith.constant 0 : index
    %0 = vector.load %arg1[%c0, %c0_0] : memref<16x128xf32, #tpu.memory_space<vmem>>, vector<16x128xf32>
    %c0_1 = arith.constant 0 : index
    %c0_2 = arith.constant 0 : index
    %1 = vector.load %arg2[%c0_1, %c0_2] : memref<128x128xf32, #tpu.memory_space<vmem>>, vector<128x128xf32>
    %cst = arith.constant dense<0.000000e+00> : vector<16x128xf32>
    %2 = tpu.matmul %0, %1, %cst {dimension_numbers = #tpu.dot_dimension_numbers<[1], [0], [0], [1], [0, 0, 1, 1], [], []>} : vector<16x128xf32>, vector<128x128xf32>, vector<16x128xf32> -> vector<16x128xf32>
    %c0_3 = arith.constant 0 : index
    %c0_4 = arith.constant 0 : index
    %3 = vector.load %arg3[%c0_3, %c0_4] : memref<128x128xf32, #tpu.memory_space<vmem>>, vector<128x128xf32>
    %cst_5 = arith.constant dense<0.000000e+00> : vector<16x128xf32>
    %4 = tpu.matmul %0, %3, %cst_5 {dimension_numbers = #tpu.dot_dimension_numbers<[1], [0], [0], [1], [0, 0, 1, 1], [], []>} : vector<16x128xf32>, vector<128x128xf32>, vector<16x128xf32> -> vector<16x128xf32>
    %5 = vector.shape_cast %2 : vector<16x128xf32> to vector<2x8x128xf32>
    %6 = vector.shape_cast %4 : vector<16x128xf32> to vector<2x8x128xf32>
    %c0_6 = arith.constant 0 : index
    %c0_7 = arith.constant 0 : index
    %7 = vector.load %arg5[%c0_6, %c0_7] : memref<28x8xf32, #tpu.memory_space<vmem>>, vector<28x8xf32>
    %c0_8 = arith.constant 0 : index
    %c0_9 = arith.constant 0 : index
    %8 = vector.load %arg6[%c0_8, %c0_9] : memref<28x8xf32, #tpu.memory_space<vmem>>, vector<28x8xf32>
    %c0_10 = arith.constant 0 : index
    %c0_11 = arith.constant 0 : index
    %9 = vector.load %arg4[%c0_10, %c0_11] : memref<1x128xf32, #tpu.memory_space<vmem>>, vector<1x128xf32>
    %10 = vector.extract_strided_slice %5 {offsets = [0, 0, 0], sizes = [1, 8, 128], strides = [1, 1, 1]} : vector<2x8x128xf32> to vector<1x8x128xf32>
    %11 = vector.shape_cast %10 : vector<1x8x128xf32> to vector<8x128xf32>
    %cst_12 = arith.constant dense<0.000000e+00> : vector<28x128xf32>
    %12 = tpu.matmul %7, %11, %cst_12 {dimension_numbers = #tpu.dot_dimension_numbers<[1], [0], [0], [1], [0, 0, 1, 1], [], []>} : vector<28x8xf32>, vector<8x128xf32>, vector<28x128xf32> -> vector<28x128xf32>
    %13 = vector.extract_strided_slice %6 {offsets = [0, 0, 0], sizes = [1, 8, 128], strides = [1, 1, 1]} : vector<2x8x128xf32> to vector<1x8x128xf32>
    %14 = vector.shape_cast %13 : vector<1x8x128xf32> to vector<8x128xf32>
    %cst_13 = arith.constant dense<0.000000e+00> : vector<28x128xf32>
    %15 = tpu.matmul %8, %14, %cst_13 {dimension_numbers = #tpu.dot_dimension_numbers<[1], [0], [0], [1], [0, 0, 1, 1], [], []>} : vector<28x8xf32>, vector<8x128xf32>, vector<28x128xf32> -> vector<28x128xf32>
    %16 = arith.addf %12, %15 : vector<28x128xf32>
    %17 = vector.broadcast %9 : vector<1x128xf32> to vector<28x128xf32>
    %18 = arith.addf %16, %17 : vector<28x128xf32>
    %c0_14 = arith.constant 0 : index
    %c0_15 = arith.constant 0 : index
    %c0_16 = arith.constant 0 : index
    %19 = vector.load %arg7[%c0_14, %c0_15, %c0_16] : memref<2x28x128xf32, #tpu.memory_space<vmem>>, vector<1x28x128xf32>
    %20 = vector.shape_cast %19 : vector<1x28x128xf32> to vector<28x128xf32>
    %21 = vector.shape_cast %18 : vector<28x128xf32> to vector<1x28x128xf32>
    tpu.vector_store %arg7[%c0_14, %c0_15, %c0_16], %21 {strides = array<i32>} : memref<2x28x128xf32, #tpu.memory_space<vmem>>, vector<1x28x128xf32>,
    %22 = vector.extract_strided_slice %5 {offsets = [1, 0, 0], sizes = [1, 8, 128], strides = [1, 1, 1]} : vector<2x8x128xf32> to vector<1x8x128xf32>
    %23 = vector.shape_cast %22 : vector<1x8x128xf32> to vector<8x128xf32>
    %cst_17 = arith.constant dense<0.000000e+00> : vector<28x128xf32>
    %24 = tpu.matmul %7, %23, %cst_17 {dimension_numbers = #tpu.dot_dimension_numbers<[1], [0], [0], [1], [0, 0, 1, 1], [], []>} : vector<28x8xf32>, vector<8x128xf32>, vector<28x128xf32> -> vector<28x128xf32>
    %25 = vector.extract_strided_slice %6 {offsets = [1, 0, 0], sizes = [1, 8, 128], strides = [1, 1, 1]} : vector<2x8x128xf32> to vector<1x8x128xf32>
    %26 = vector.shape_cast %25 : vector<1x8x128xf32> to vector<8x128xf32>
    %cst_18 = arith.constant dense<0.000000e+00> : vector<28x128xf32>
    %27 = tpu.matmul %8, %26, %cst_18 {dimension_numbers = #tpu.dot_dimension_numbers<[1], [0], [0], [1], [0, 0, 1, 1], [], []>} : vector<28x8xf32>, vector<8x128xf32>, vector<28x128xf32> -> vector<28x128xf32>
    %28 = arith.addf %24, %27 : vector<28x128xf32>
    %29 = vector.broadcast %9 : vector<1x128xf32> to vector<28x128xf32>
    %30 = arith.addf %28, %29 : vector<28x128xf32>
    %c1 = arith.constant 1 : index
    %c0_19 = arith.constant 0 : index
    %c0_20 = arith.constant 0 : index
    %31 = vector.load %arg7[%c1, %c0_19, %c0_20] : memref<2x28x128xf32, #tpu.memory_space<vmem>>, vector<1x28x128xf32>
    %32 = vector.shape_cast %31 : vector<1x28x128xf32> to vector<28x128xf32>
    %33 = vector.shape_cast %30 : vector<28x128xf32> to vector<1x28x128xf32>
    tpu.vector_store %arg7[%c1, %c0_19, %c0_20], %33 {strides = array<i32>} : memref<2x28x128xf32, #tpu.memory_space<vmem>>, vector<1x28x128xf32>,
    return
  }
  func.func @transform_0(%arg0: i32) -> (i32, i32) {
    %c0_i32 = arith.constant 0 : i32
    %c0_i32_0 = arith.constant 0 : i32
    return %arg0, %c0_i32 : i32, i32
  }
  func.func @transform_1(%arg0: i32) -> (i32, i32) {
    %c0_i32 = arith.constant 0 : i32
    %c0_i32_0 = arith.constant 0 : i32
    %c0_i32_1 = arith.constant 0 : i32
    return %c0_i32, %c0_i32_0 : i32, i32
  }
  func.func @transform_2(%arg0: i32) -> (i32, i32) {
    %c0_i32 = arith.constant 0 : i32
    %c0_i32_0 = arith.constant 0 : i32
    %c0_i32_1 = arith.constant 0 : i32
    return %c0_i32, %c0_i32_0 : i32, i32
  }
  func.func @transform_3(%arg0: i32) -> (i32, i32) {
    %c0_i32 = arith.constant 0 : i32
    %c0_i32_0 = arith.constant 0 : i32
    %c0_i32_1 = arith.constant 0 : i32
    return %c0_i32, %c0_i32_0 : i32, i32
  }
  func.func @transform_4(%arg0: i32) -> (i32, i32) {
    %c0_i32 = arith.constant 0 : i32
    %c0_i32_0 = arith.constant 0 : i32
    %c0_i32_1 = arith.constant 0 : i32
    return %c0_i32, %c0_i32_0 : i32, i32
  }
  func.func @transform_5(%arg0: i32) -> (i32, i32) {
    %c0_i32 = arith.constant 0 : i32
    %c0_i32_0 = arith.constant 0 : i32
    %c0_i32_1 = arith.constant 0 : i32
    return %c0_i32, %c0_i32_0 : i32, i32
  }
  func.func @transform_6(%arg0: i32) -> (i32, i32, i32) {
    %c0_i32 = arith.constant 0 : i32
    %c0_i32_0 = arith.constant 0 : i32
    %c0_i32_1 = arith.constant 0 : i32
    return %arg0, %c0_i32, %c0_i32_0 : i32, i32, i32
  }
}

</mosaic_0001>

<bundles_post_ra>
// kernel: tpu_custom_call.1
= control target key start
LH: loop header
LB: loop body
LE: loop exit
PB: predicated region body
PF: predicated region fallthrough
CT: control target
= control target key end

     0   :  { %11 = vsyncpa [#allocation3], 0  ;;  %s508_s0 = inlined_call_operand.vmem [shape: f32[16,128], index: 0, kind: input, shape index: {}]   ;;  %s509_s1 = inlined_call_operand.hbm [shape: f32[128,128], index: 1, kind: input, shape index: {}]   ;;  %s510_s2 = inlined_call_operand.hbm [shape: f32[128,128], index: 2, kind: input, shape index: {}]   ;;  %s511_s3 = inlined_call_operand.vmem [shape: f32[1,128], index: 3, kind: input, shape index: {}]   ;;  %s512_s4 = inlined_call_operand.vmem [shape: f32[28,8], index: 4, kind: input, shape index: {}]   ;;  %s513_s5 = inlined_call_operand.vmem [shape: f32[28,8], index: 5, kind: input, shape index: {}]   ;;  %s514_s6 = inlined_call_operand.vmem [shape: f32[2,28,128], index: 6, kind: output, shape index: {}]  }
   0x1   :  { %s19_s23 = sshll.u32 %s509_s1, 4  ;;  %s20_s23 = int_to_ptr.hbm [resolvable:$true] %s19_s23 }
   0x2   :  { %12 = vsyncpa [#allocation5], 0  ;;  %s390_s24 = smov [#allocation2]   ;;  %s32_s28 = sshll.u32 %s510_s2, 4  ;;  %s33_s28 = int_to_ptr.hbm [resolvable:$true] %s32_s28 }
   0x3   :  { %s21_s25 = sshll.u32 %s390_s24, 4  ;;  %s391_s29 = smov 128   ;;  %s22_s25 = int_to_ptr.vmem [resolvable:$true] %s21_s25 }
   0x4   :  { %s392_s30 = smov 8   ;;  %s393_s7 = smov [#allocation4]  }
   0x5   :  { %27 = dma.hbm_to_vmem [thread:$0]  %s20_s23, 2048, %s22_s25, [#allocation3], %s391_s29, %s391_s29, %s392_s30  }
   0x6   :  { %s34_s8 = sshll.u32 %s393_s7, 4  ;;  %s35_s8 = int_to_ptr.vmem [resolvable:$true] %s34_s8 }
   0x7   :  { %40 = dma.hbm_to_vmem [thread:$0]  %s33_s28, 2048, %s35_s8, [#allocation5], %s391_s29, %s391_s29, %s392_s30  }
   0x8   :  { %386 = dma.done.wait [#allocation3], 2048  }
   0x9   :  { %387 = vsyncadd [#allocation3], 4294965248 }
   0xa   :  { %388 = dma.done.wait [#allocation5], 2048  }
   0xb   :  { %389 = vsyncadd [#allocation5], 4294965248  ;;  %v72_v0 = vld [vmem:[#allocation2 + $0x78] sm:$0xff]  ;;  %v71_v2 = vld [vmem:[#allocation2 + $0x70] sm:$0xff]  ;;  %vm144_vm0 = vcmask 64512  }
   0xc   :  { %v111_v1 = vld [vmem:[#allocation4 + $0x78] sm:$0xff]  ;;  %73 = vmatpush.msra.mxu0 %v72_v0  ;;  %v110_v3 = vld [vmem:[#allocation4 + $0x70] sm:$0xff]  ;;  %v70_v4 = vld [vmem:[#allocation2 + $0x68] sm:$0xff] }
   0xd   :  { %112 = vmatpush.msra.mxu1 %v111_v1  ;;  %v109_v5 = vld [vmem:[#allocation4 + $0x68] sm:$0xff]  ;;  %v69_v6 = vld [vmem:[#allocation2 + $0x60] sm:$0xff]  ;;  %v68_v8 = vld [vmem:[#allocation2 + $0x58] sm:$0xff] }
   0xe   :  { %74 = vmatpush.msra.mxu0 %v71_v2  ;;  %v108_v7 = vld [vmem:[#allocation4 + $0x60] sm:$0xff]  ;;  %v107_v9 = vld [vmem:[#allocation4 + $0x58] sm:$0xff]  ;;  %v67_v10 = vld [vmem:[#allocation2 + $0x50] sm:$0xff] }
   0xf   :  { %113 = vmatpush.msra.mxu1 %v110_v3  ;;  %v106_v11 = vld [vmem:[#allocation4 + $0x50] sm:$0xff]  ;;  %v66_v12 = vld [vmem:[#allocation2 + $0x48] sm:$0xff]  ;;  %v65_v14 = vld [vmem:[#allocation2 + $0x40] sm:$0xff] }
  0x10   :  { %75 = vmatpush.msra.mxu0 %v70_v4  ;;  %v105_v13 = vld [vmem:[#allocation4 + $0x48] sm:$0xff]  ;;  %v104_v15 = vld [vmem:[#allocation4 + $0x40] sm:$0xff]  ;;  %v64_v16 = vld [vmem:[#allocation2 + $0x38] sm:$0xff] }
  0x11   :  { %114 = vmatpush.msra.mxu1 %v109_v5  ;;  %v103_v17 = vld [vmem:[#allocation4 + $0x38] sm:$0xff]  ;;  %v63_v18 = vld [vmem:[#allocation2 + $0x30] sm:$0xff]  ;;  %v62_v20 = vld [vmem:[#allocation2 + $0x28] sm:$0xff] }
  0x12   :  { %76 = vmatpush.msra.mxu0 %v69_v6  ;;  %v102_v19 = vld [vmem:[#allocation4 + $0x30] sm:$0xff]  ;;  %v101_v21 = vld [vmem:[#allocation4 + $0x28] sm:$0xff]  ;;  %v61_v22 = vld [vmem:[#allocation2 + $0x20] sm:$0xff] }
  0x13   :  { %115 = vmatpush.msra.mxu1 %v108_v7  ;;  %v100_v23 = vld [vmem:[#allocation4 + $0x20] sm:$0xff]  ;;  %v60_v24 = vld [vmem:[#allocation2 + $0x18] sm:$0xff]  ;;  %v59_v26 = vld [vmem:[#allocation2 + $0x10] sm:$0xff] }
  0x14   :  { %77 = vmatpush.msra.mxu0 %v68_v8  ;;  %v99_v25 = vld [vmem:[#allocation4 + $0x18] sm:$0xff]  ;;  %v98_v27 = vld [vmem:[#allocation4 + $0x10] sm:$0xff]  ;;  %v58_v28 = vld [vmem:[#allocation2 + $0x8] sm:$0xff] }
  0x15   :  { %116 = vmatpush.msra.mxu1 %v107_v9  ;;  %v97_v29 = vld [vmem:[#allocation4 + $0x8] sm:$0xff]  ;;  %v57_v30 = vld [vmem:[#allocation2] sm:$0xff]  ;;  %v141_v42 = vld [vmem:[%s513_s5 + $0x10] sm:$0xff] }
  0x16   :  { %78 = vmatpush.msra.mxu0 %v67_v10  ;;  %v96_v31 = vld [vmem:[#allocation4] sm:$0xff]  ;;  %v56_v33 = vld [vmem:[%s508_s0 + $0x8] sm:$0xff]  ;;  %v137_v43 = vld [vmem:[%s512_s4 + $0x10] sm:$0xff] }
  0x17   :  { %117 = vmatpush.msra.mxu1 %v106_v11  ;;  %v55_v32 = vld [vmem:[%s508_s0] sm:$0xff]  ;;  %v140_v36 = vld [vmem:[%s513_s5 + $0x8] sm:$0xff]  ;;  %v142_v44 = vld [vmem:[%s513_s5 + $0x18] sm:$0xf] }
  0x18   :  { %79 = vmatpush.msra.mxu0 %v66_v12  ;;  %v136_v37 = vld [vmem:[%s512_s4 + $0x8] sm:$0xff]  ;;  %v139_v38 = vld [vmem:[%s513_s5] sm:$0xff]  ;;  %v138_v45 = vld [vmem:[%s512_s4 + $0x18] sm:$0xf] }
  0x19   :  { %118 = vmatpush.msra.mxu1 %v105_v13  ;;  %v135_v39 = vld [vmem:[%s512_s4] sm:$0xff] }
  0x1a   :  { %80 = vmatpush.msra.mxu0 %v65_v14  ;;  %v337_v46 = vld [vmem:[%s511_s3] ss:$0 sm:$0xff] }
  0x1b   :  { %119 = vmatpush.msra.mxu1 %v104_v15 }
  0x1c   :  { %81 = vmatpush.msra.mxu0 %v64_v16 }
  0x1d   :  { %120 = vmatpush.msra.mxu1 %v103_v17 }
  0x1e   :  { %82 = vmatpush.msra.mxu0 %v63_v18 }
  0x1f   :  { %121 = vmatpush.msra.mxu1 %v102_v19 }
  0x20   :  { %83 = vmatpush.msra.mxu0 %v62_v20 }
  0x21   :  { %122 = vmatpush.msra.mxu1 %v101_v21 }
  0x22   :  { %84 = vmatpush.msra.mxu0 %v61_v22 }
  0x23   :  { %123 = vmatpush.msra.mxu1 %v100_v23 }
  0x24   :  { %85 = vmatpush.msra.mxu0 %v60_v24 }
  0x25   :  { %124 = vmatpush.msra.mxu1 %v99_v25 }
  0x26   :  { %86 = vmatpush.msra.mxu0 %v59_v26 }
  0x27   :  { %125 = vmatpush.msra.mxu1 %v98_v27 }
  0x28   :  { %87 = vmatpush.msra.mxu0 %v58_v28 }
  0x29   :  { %126 = vmatpush.msra.mxu1 %v97_v29 }
  0x2a   :  { %88 = vmatpush.msra.mxu0 %v57_v30 }
  0x2b   :  { %127 = vmatpush.msra.mxu1 %v96_v31  ;;  %89 = vmatmul.f32.vlgmr.msra.gmra.mxu0 %v55_v32 }
  0x2c   :  { %128 = vmatmul.f32.vlgmr.msra.gmra.mxu1 %v55_v32 }
  0x33   :  { %92 = vmatmul.f32.gmra.mxu0 %v56_v33 }
  0x34   :  { %131 = vmatmul.f32.gmra.mxu1 %v56_v33 }
  0xa8   :  { %v90_v34 = vpop.f32.mrf.mxu0 }
  0xa9   :  { %v129_v35 = vpop.f32.mrf.mxu1  ;;  %213 = vmatpush.msrb.mxu1 %v90_v34  ;;  %332 = vmatpush.msra.mxu3 %v90_v34 }
  0xaa   :  { %172 = vmatpush.msrb.mxu0 %v129_v35  ;;  %331 = vmatpush.msra.mxu2 %v129_v35 }
  0xab   :  { %312 = vmatmul.msk.f32.vlgmr.msra.gmra.mxu2 %vm144_vm0, %v140_v36  ;;  %316 = vmatmul.msk.f32.vlgmr.msra.gmra.mxu3 %vm144_vm0, %v136_v37 }
  0xac   :  { %311 = vmatmul.msk.f32.vlgmr.msrb.gmra.mxu0 %vm144_vm0, %v139_v38  ;;  %315 = vmatmul.msk.f32.vlgmr.msrb.gmra.mxu1 %vm144_vm0, %v135_v39 }
  0xb0   :  { %v93_v40 = vpop.f32.mrf.mxu0 }
  0xb1   :  { %v132_v41 = vpop.f32.mrf.mxu1  ;;  %282 = vmatpush.msrb.mxu3 %v93_v40 }
  0xb2   :  { %253 = vmatpush.msrb.mxu2 %v132_v41 }
  0xb3   :  { %313 = vmatmul.msk.f32.gmra.mxu2 %vm144_vm0, %v141_v42  ;;  %317 = vmatmul.msk.f32.gmra.mxu3 %vm144_vm0, %v137_v43 }
  0xbb   :  { %314 = vmatmul.msk.f32.gmra.mxu2 %vm144_vm0, %v142_v44  ;;  %318 = vmatmul.msk.f32.gmra.mxu3 %vm144_vm0, %v138_v45 }
  0xc3   :  { %319 = vmatmul.msk.f32.vlgmr.msrb.gmra.mxu2 %vm144_vm0, %v139_v38  ;;  %323 = vmatmul.msk.f32.vlgmr.msrb.gmra.mxu3 %vm144_vm0, %v135_v39 }
  0xcb   :  { %320 = vmatmul.msk.f32.gmra.mxu2 %vm144_vm0, %v140_v36  ;;  %324 = vmatmul.msk.f32.gmra.mxu3 %vm144_vm0, %v136_v37 }
  0xd3   :  { %321 = vmatmul.msk.f32.gmra.mxu2 %vm144_vm0, %v141_v42  ;;  %325 = vmatmul.msk.f32.gmra.mxu3 %vm144_vm0, %v137_v43 }
  0xdb   :  { %322 = vmatmul.msk.f32.gmra.mxu2 %vm144_vm0, %v142_v44  ;;  %326 = vmatmul.msk.f32.gmra.mxu3 %vm144_vm0, %v138_v45 }
 0x129   :  { %v174_v55 = vpop.f32.mrf.mxu0  ;;  %v215_v56 = vpop.f32.mrf.mxu1 }
 0x12a   :  { %v216_v57 = vadd.f32 %v215_v56, %v174_v55 }
 0x12c   :  { %v230_v60 = vadd.f32 %v337_v46, %v216_v57 }
 0x12e   :  { %v177_v47 = vpop.f32.mrf.mxu2  ;;  %v218_v48 = vpop.f32.mrf.mxu3  ;;  %234 = vst [vmem:[%s514_s6] sm:$0xff] %v230_v60 }
 0x12f   :  { %v219_v49 = vadd.f32 %v218_v48, %v177_v47 }
 0x131   :  { %v231_v50 = vadd.f32 %v337_v46, %v219_v49 }
 0x133   :  { %235 = vst [vmem:[%s514_s6 + $0x8] sm:$0xff] %v231_v50 }
 0x136   :  { %v180_v51 = vpop.f32.mrf.mxu2  ;;  %v221_v52 = vpop.f32.mrf.mxu3 }
 0x137   :  { %v222_v53 = vadd.f32 %v221_v52, %v180_v51 }
 0x139   :  { %v232_v54 = vadd.f32 %v337_v46, %v222_v53 }
 0x13b   :  { %236 = vst [vmem:[%s514_s6 + $0x10] sm:$0xff] %v232_v54 }
 0x13e   :  { %v183_v58 = vpop.f32.mrf.mxu2  ;;  %v224_v59 = vpop.f32.mrf.mxu3 }
 0x13f   :  { %v225_v61 = vadd.f32 %v224_v59, %v183_v58 }
 0x141   :  { %v233_v62 = vadd.f32 %v337_v46, %v225_v61 }
 0x143   :  { %237 = vst [vmem:[%s514_s6 + $0x18] sm:$0xf] %v233_v62 }
 0x146   :  { %v255_v63 = vpop.f32.mrf.mxu2  ;;  %v284_v0 = vpop.f32.mrf.mxu3 }
 0x147   :  { %v285_v1 = vadd.f32 %v284_v0, %v255_v63 }
 0x149   :  { %v296_v2 = vadd.f32 %v337_v46, %v285_v1 }
 0x14b   :  { %327 = vst [vmem:[%s514_s6 + $0x20] sm:$0xff] %v296_v2 }
 0x14e   :  { %v258_v3 = vpop.f32.mrf.mxu2  ;;  %v287_v4 = vpop.f32.mrf.mxu3 }
 0x14f   :  { %v288_v5 = vadd.f32 %v287_v4, %v258_v3 }
 0x151   :  { %v297_v6 = vadd.f32 %v337_v46, %v288_v5 }
 0x153   :  { %328 = vst [vmem:[%s514_s6 + $0x28] sm:$0xff] %v297_v6 }
 0x156   :  { %v261_v7 = vpop.f32.mrf.mxu2  ;;  %v290_v8 = vpop.f32.mrf.mxu3 }
 0x157   :  { %v291_v9 = vadd.f32 %v290_v8, %v261_v7 }
 0x159   :  { %v298_v10 = vadd.f32 %v337_v46, %v291_v9 }
 0x15b   :  { %329 = vst [vmem:[%s514_s6 + $0x30] sm:$0xff] %v298_v10 }
 0x15e   :  { %v264_v11 = vpop.f32.mrf.mxu2  ;;  %v293_v12 = vpop.f32.mrf.mxu3 }
 0x15f   :  { %v294_v13 = vadd.f32 %v293_v12, %v264_v11 }
 0x161   :  { %v299_v14 = vadd.f32 %v337_v46, %v294_v13 }
 0x163   :  { %330 = vst [vmem:[%s514_s6 + $0x38] sm:$0xf] %v299_v14 }
 0x164   :  { %309 = vsyncpa [#allocation3], 1 }
 0x165   :  { %310 = vsyncpa [#allocation5], 1 }

</bundles_post_ra>
